<compile_context>
chip_gen: v5e
topology: v5e:2x2
jax: 0.10.0
libtpu: 0.0.40
codegen_flags: <defaults>
</compile_context>

<pallas_src>
import functools

import jax
import jax.numpy as jnp
from jax.experimental import pallas as pl
from jax.experimental.pallas import tpu as pltpu

EPS = 1e-5
LANE = 128


def _round_up(x, m):
    return (x + m - 1) // m * m


def _tpu_info():
    """Best-effort hardware query: (is_v7x_like, is_v5_like, vmem_capacity_bytes)."""
    kind = ""
    try:
        kind = jax.devices()[0].device_kind.lower()
    except Exception:
        pass
    is_v7 = "7" in kind
    is_v5 = "v5" in kind
    vmem_cap = 0
    try:
        vmem_cap = int(getattr(pltpu.get_tpu_info(), "vmem_capacity_bytes", 0))
    except Exception:
        vmem_cap = 0
    if vmem_cap <= 0:
        vmem_cap = (64 if is_v7 else 128) * 1024 * 1024
    return is_v7, is_v5, vmem_cap


def _layernorm_affine(y, g, beta, n_valid):
    """One-pass LayerNorm over the last axis of f32 y.

    Padded output columns are exactly zero (zero weight columns + zero bias), so plain
    sums over the padded axis equal the sums over the n_valid real columns.  gamma/beta
    are zero in padded columns, so padded outputs stay finite and are sliced off later.
    """
    inv_n = jnp.float32(1.0 / n_valid)
    mean = jnp.sum(y, axis=-1, keepdims=True) * inv_n
    ex2 = jnp.sum(y * y, axis=-1, keepdims=True) * inv_n
    var = jnp.maximum(ex2 - mean * mean, 0.0)
    yn = (y - mean) * jax.lax.rsqrt(var + EPS)
    return yn * g + beta


def _fused_kernel(x_ref, w_ref, b_ref, g_ref, beta_ref, o_ref, *, n_valid):
    # Single-K-step path: full [K, OUT_pad] weight resident in VMEM.
    y = jnp.dot(x_ref[...], w_ref[...], preferred_element_type=jnp.float32)
    y = y + b_ref[...]
    o_ref[...] = _layernorm_affine(y, g_ref[...], beta_ref[...], n_valid).astype(o_ref.dtype)


def _ktiled_kernel(x_ref, w_ref, b_ref, g_ref, beta_ref, o_ref, acc_ref, *, n_valid):
    # K-tiled path: weight streamed block-by-block, f32 accumulator in VMEM scratch.
    k = pl.program_id(1)

    @pl.when(k == 0)
    def _():
        acc_ref[...] = jnp.zeros_like(acc_ref)

    acc_ref[...] += jnp.dot(x_ref[...], w_ref[...], preferred_element_type=jnp.float32)

    @pl.when(k == pl.num_programs(1) - 1)
    def _():
        y = acc_ref[...] + b_ref[...]
        o_ref[...] = _layernorm_affine(y, g_ref[...], beta_ref[...], n_valid).astype(o_ref.dtype)


def prepare_linear_lnorm_params(w, b, gamma, beta, *, matmul_dtype=None, force_tk=None):
    """One-time parameter layout prep (hoisted out of the per-call path).

    w: [OUT, IN] (PyTorch fc.weight layout).  Returns a dict with the weight
    pre-transposed / zero-padded to [K_pad, OUT_pad] in the matmul dtype, f32
    bias/gamma/beta rows padded to OUT_pad, and the tiling metadata.
    """
    out_dim, in_dim = w.shape
    matmul_dtype = jnp.dtype(matmul_dtype) if matmul_dtype is not None else jnp.dtype(w.dtype)
    bpe = matmul_dtype.itemsize

    is_v7, is_v5, vmem_cap = _tpu_info()
    vmem_budget = int(vmem_cap * 0.85)

    # Lane-dense output padding; prefer a 256-multiple on v6e/v7x (2x256x256 MXU)
    # when the extra padded columns are a small fraction of OUT.
    out_pad = _round_up(out_dim, LANE)
    if (not is_v5) and out_dim >= 2 * LANE:
        cand = _round_up(out_dim, 2 * LANE)
        if (cand - out_dim) * 8 <= out_dim:
            out_pad = cand

    # Decide whether the single-buffered resident weight fits comfortably; if not,
    # stream the reduction (K) axis block by block.
    weight_budget = max(vmem_budget // 3, 4 * 1024 * 1024)
    w_bytes_full = in_dim * out_pad * bpe
    if force_tk is not None:
        tk = max(_round_up(int(force_tk), LANE), LANE)
        k_pad = _round_up(in_dim, tk)
        k_tiles = k_pad // tk
        if k_tiles == 1:
            tk = k_pad = in_dim
    elif w_bytes_full <= weight_budget:
        tk = k_pad = in_dim
        k_tiles = 1
    else:
        # Double-buffered [tk, OUT_pad] weight blocks must fit the weight budget.
        tk = max((weight_budget // (2 * out_pad * bpe)) // LANE * LANE, LANE)
        tk = min(tk, _round_up(in_dim, LANE))
        k_pad = _round_up(in_dim, tk)
        k_tiles = k_pad // tk

    w_io = jnp.pad(
        jnp.transpose(w).astype(matmul_dtype),
        ((0, k_pad - in_dim), (0, out_pad - out_dim)),
    )
    b2 = jnp.pad(b.astype(jnp.float32), (0, out_pad - out_dim)).reshape(1, out_pad)
    g2 = jnp.pad(gamma.astype(jnp.float32), (0, out_pad - out_dim)).reshape(1, out_pad)
    beta2 = jnp.pad(beta.astype(jnp.float32), (0, out_pad - out_dim)).reshape(1, out_pad)

    return dict(
        w_io=w_io, b2=b2, g2=g2, beta2=beta2,
        in_dim=in_dim, out_dim=out_dim, out_pad=out_pad,
        k_pad=k_pad, tk=tk, k_tiles=k_tiles,
        matmul_dtype=matmul_dtype,
        is_v7=is_v7, vmem_budget=vmem_budget,
    )


def linear_nd_lnorm(x, params, *, out_dtype=None, tm=None):
    """x: [..., IN] -> [..., OUT] using prepared params (see prepare_linear_lnorm_params)."""
    in_dim, out_dim, out_pad = params["in_dim"], params["out_dim"], params["out_pad"]
    k_pad, tk, k_tiles = params["k_pad"], params["tk"], params["k_tiles"]
    matmul_dtype = params["matmul_dtype"]
    is_v7, vmem_budget = params["is_v7"], params["vmem_budget"]

    assert x.shape[-1] == in_dim, "last dim of x must equal in_features"
    out_dtype = jnp.dtype(out_dtype) if out_dtype is not None else jnp.dtype(x.dtype)
    lead = x.shape[:-1]

    x2d = x.reshape(-1, in_dim).astype(matmul_dtype)
    if k_pad != in_dim:
        x2d = jnp.pad(x2d, ((0, 0), (0, k_pad - in_dim)))  # zero K-pad: exact for matmul
    M = x2d.shape[0]

    bpe = matmul_dtype.itemsize
    sublane = 8 * (4 // bpe)  # 8 rows for f32, 16 for bf16 (sublane packing)

    # Row tile: 512 default on v5e/v6e, 256 on v7x; clamp to the (sublane-rounded) rows.
    if tm is None:
        tm = 256 if is_v7 else 512
    tm_eff = min(_round_up(tm, sublane), _round_up(M, sublane))

    # On v7x make sure the "parallel" M axis has >= 2 steps so both TensorCores get work.
    if is_v7 and pl.cdiv(M, tm_eff) < 2 and M > sublane:
        tm_eff = _round_up(pl.cdiv(M, 2), sublane)

    # Shrink tm until the per-step VMEM footprint fits the generation-aware budget.
    w_buffers = 1 if k_tiles == 1 else 2  # constant weight gets Buffered(1)

    def footprint(tm_):
        return (2 * tm_ * tk * bpe                               # x tiles (double-buffered)
                + w_buffers * tk * out_pad * bpe                  # weight block(s)
                + 6 * out_pad * 4                                 # bias / gamma / beta
                + 2 * tm_ * out_pad * out_dtype.itemsize          # output tiles
                + (3 if k_tiles > 1 else 2) * tm_ * out_pad * 4)  # acc scratch + f32 temps

    while tm_eff > sublane and footprint(tm_eff) > vmem_budget:
        tm_eff = max(_round_up(tm_eff // 2, sublane), sublane)

    m_tiles = pl.cdiv(M, tm_eff)
    vmem_limit = int(min(max(int(footprint(tm_eff) * 1.25), 16 * 1024 * 1024), vmem_budget))

    cost = pl.CostEstimate(
        flops=int(2 * M * k_pad * out_pad + 10 * M * out_pad),
        transcendentals=int(M),
        bytes_accessed=int(M * k_pad * bpe + k_pad * out_pad * bpe
                           + M * out_pad * out_dtype.itemsize),
    )

    def run(conservative):
        const_mode = {} if conservative else {"pipeline_mode": pl.Buffered(1)}
        if k_tiles == 1:
            grid = (m_tiles,)
            in_specs = [
                pl.BlockSpec((tm_eff, k_pad), lambda i: (i, 0)),                 # x row tile
                pl.BlockSpec((k_pad, out_pad), lambda i: (0, 0), **const_mode),  # resident W
                pl.BlockSpec((1, out_pad), lambda i: (0, 0), **const_mode),      # bias
                pl.BlockSpec((1, out_pad), lambda i: (0, 0), **const_mode),      # gamma
                pl.BlockSpec((1, out_pad), lambda i: (0, 0), **const_mode),      # beta
            ]
            out_spec = pl.BlockSpec((tm_eff, out_pad), lambda i: (i, 0))
            kernel = functools.partial(_fused_kernel, n_valid=out_dim)
            scratch = []
            dims = ("parallel",)
        else:
            grid = (m_tiles, k_tiles)
            in_specs = [
                pl.BlockSpec((tm_eff, tk), lambda i, k: (i, k)),                  # x tile
                pl.BlockSpec((tk, out_pad), lambda i, k: (k, 0)),                 # W K-block
                pl.BlockSpec((1, out_pad), lambda i, k: (0, 0), **const_mode),    # bias
                pl.BlockSpec((1, out_pad), lambda i, k: (0, 0), **const_mode),    # gamma
                pl.BlockSpec((1, out_pad), lambda i, k: (0, 0), **const_mode),    # beta
            ]
            out_spec = pl.BlockSpec((tm_eff, out_pad), lambda i, k: (i, 0))
            kernel = functools.partial(_ktiled_kernel, n_valid=out_dim)
            scratch = [pltpu.VMEM((tm_eff, out_pad), jnp.float32)]
            dims = ("parallel", "arbitrary")

        call_kwargs = {} if conservative else {"cost_estimate": cost}
        return pl.pallas_call(
            kernel,
            out_shape=jax.ShapeDtypeStruct((M, out_pad), out_dtype),
            grid_spec=pltpu.PrefetchScalarGridSpec(
                num_scalar_prefetch=0,
                grid=grid,
                in_specs=in_specs,
                out_specs=out_spec,
                scratch_shapes=scratch,
            ),
            compiler_params=pltpu.CompilerParams(
                dimension_semantics=dims,
                vmem_limit_bytes=vmem_limit,
            ),
            **call_kwargs,
        )(x2d, params["w_io"], params["b2"], params["g2"], params["beta2"])

    try:
        out2d = run(conservative=False)
    except Exception:
        # Older Pallas versions may reject pl.Buffered(1) / cost_estimate; retry plainly.
        out2d = run(conservative=True)

    return out2d[:, :out_dim].reshape(*lead, out_dim)


def _reference(x, w, b, gamma, beta):
    y = jnp.einsum("...i,oi->...o", x, w) + b
    mean = jnp.mean(y, axis=-1, keepdims=True)
    var = jnp.mean((y - mean) ** 2, axis=-1, keepdims=True)
    return (y - mean) / jnp.sqrt(var + EPS) * gamma + beta


if __name__ == "__main__":
    key = jax.random.PRNGKey(0)
    kx, kw, kb, kx2, kw2, kb2 = jax.random.split(key, 6)

    # --- Test 1: small ND input, resident-weight fused path (f32 and bf16 operands). ---
    B, S, IN, OUT = 2, 8, 32, 32
    x = jax.random.normal(kx, (B, S, IN), dtype=jnp.float32)
    bound = 1.0 / (IN ** 0.5)
    w = jax.random.uniform(kw, (OUT, IN), jnp.float32, -bound, bound)    # fc.weight
    b = jax.random.uniform(kb, (OUT,), jnp.float32, -bound, bound)       # fc.bias
    gamma = jnp.ones((OUT,), jnp.float32)                                # Lnorm.weight
    beta = jnp.zeros((OUT,), jnp.float32)                                # Lnorm.bias
    ref = _reference(x, w, b, gamma, beta)

    params_f32 = prepare_linear_lnorm_params(w, b, gamma, beta)          # prep once
    out = jax.block_until_ready(linear_nd_lnorm(x, params_f32))
    assert out.shape == (B, S, OUT)
    assert jnp.allclose(out, ref, atol=5e-5, rtol=5e-5), "f32 mismatch vs reference"

    params_bf16 = prepare_linear_lnorm_params(w, b, gamma, beta, matmul_dtype=jnp.bfloat16)
    out_bf16 = jax.block_until_ready(linear_nd_lnorm(x, params_bf16))
    assert out_bf16.shape == (B, S, OUT)
    assert jnp.allclose(out_bf16, ref, atol=1e-1, rtol=5e-2), "bf16 mismatch vs reference"

    # --- Test 2: force the K-tiled accumulator path (as used for very large weights). ---
    IN2, OUT2 = 256, 64
    x2 = jax.random.normal(kx2, (B, S, IN2), dtype=jnp.float32)
    bound2 = 1.0 / (IN2 ** 0.5)
    w2 = jax.random.uniform(kw2, (OUT2, IN2), jnp.float32, -bound2, bound2)
    b2 = jax.random.uniform(kb2, (OUT2,), jnp.float32, -bound2, bound2)
    gamma2 = jnp.ones((OUT2,), jnp.float32)
    beta2 = jnp.zeros((OUT2,), jnp.float32)
    ref2 = _reference(x2, w2, b2, gamma2, beta2)

    params_kt = prepare_linear_lnorm_params(w2, b2, gamma2, beta2, force_tk=128)
    assert params_kt["k_tiles"] == 2
    out2 = jax.block_until_ready(linear_nd_lnorm(x2, params_kt))
    assert out2.shape == (B, S, OUT2)
    assert jnp.allclose(out2, ref2, atol=5e-5, rtol=5e-5), "K-tiled mismatch vs reference"

    print("KERNEL_OK")
</pallas_src>

<mosaic_0001>
module attributes {stable_mosaic.version = 11 : i64} {
  func.func @_fused_kernel(%arg0: i32, %arg1: memref<16x32xf32, #tpu.memory_space<vmem>>, %arg2: memref<32x128xf32, #tpu.memory_space<vmem>>, %arg3: memref<1x128xf32, #tpu.memory_space<vmem>>, %arg4: memref<1x128xf32, #tpu.memory_space<vmem>>, %arg5: memref<1x128xf32, #tpu.memory_space<vmem>>, %arg6: memref<16x128xf32, #tpu.memory_space<vmem>>) attributes {dimension_semantics = [#tpu.dimension_semantics<parallel>], iteration_bounds = array<i64: 1>, scalar_prefetch = 0 : i64, scratch_operands = 0 : i64, tpu.core_type = #tpu.core_type<tc>, window_params = [{transform_indices = @transform_0, window_bounds = array<i64: 16, 32>}, {pipeline_mode = #tpu.pipeline_mode<synchronous>, transform_indices = @transform_1, window_bounds = array<i64: 32, 128>}, {pipeline_mode = #tpu.pipeline_mode<synchronous>, transform_indices = @transform_2, window_bounds = array<i64: 1, 128>}, {pipeline_mode = #tpu.pipeline_mode<synchronous>, transform_indices = @transform_3, window_bounds = array<i64: 1, 128>}, {pipeline_mode = #tpu.pipeline_mode<synchronous>, transform_indices = @transform_4, window_bounds = array<i64: 1, 128>}, {transform_indices = @transform_5, window_bounds = array<i64: 16, 128>}]} {
    %c0 = arith.constant 0 : index
    %c0_0 = arith.constant 0 : index
    %0 = vector.load %arg1[%c0, %c0_0] : memref<16x32xf32, #tpu.memory_space<vmem>>, vector<16x32xf32>
    %c0_1 = arith.constant 0 : index
    %c0_2 = arith.constant 0 : index
    %1 = vector.load %arg2[%c0_1, %c0_2] : memref<32x128xf32, #tpu.memory_space<vmem>>, vector<32x128xf32>
    %cst = arith.constant dense<0.000000e+00> : vector<16x128xf32>
    %2 = tpu.matmul %0, %1, %cst {dimension_numbers = #tpu.dot_dimension_numbers<[1], [0], [0], [1], [0, 0, 1, 1], [], []>} : vector<16x32xf32>, vector<32x128xf32>, vector<16x128xf32> -> vector<16x128xf32>
    %c0_3 = arith.constant 0 : index
    %c0_4 = arith.constant 0 : index
    %3 = vector.load %arg3[%c0_3, %c0_4] : memref<1x128xf32, #tpu.memory_space<vmem>>, vector<1x128xf32>
    %4 = vector.broadcast %3 : vector<1x128xf32> to vector<16x128xf32>
    %5 = arith.addf %2, %4 : vector<16x128xf32>
    %c0_5 = arith.constant 0 : index
    %c0_6 = arith.constant 0 : index
    %6 = vector.load %arg4[%c0_5, %c0_6] : memref<1x128xf32, #tpu.memory_space<vmem>>, vector<1x128xf32>
    %c0_7 = arith.constant 0 : index
    %c0_8 = arith.constant 0 : index
    %7 = vector.load %arg5[%c0_7, %c0_8] : memref<1x128xf32, #tpu.memory_space<vmem>>, vector<1x128xf32>
    %cst_9 = arith.constant dense<0.000000e+00> : vector<16xf32>
    %8 = vector.multi_reduction <add>, %5, %cst_9 [1] : vector<16x128xf32> to vector<16xf32>
    %9 = vector.shape_cast %8 : vector<16xf32> to vector<16x1xf32>
    %cst_10 = arith.constant 3.125000e-02 : f32
    %10 = vector.broadcast %cst_10 : f32 to vector<16x1xf32>
    %11 = arith.mulf %9, %10 : vector<16x1xf32>
    %12 = arith.mulf %5, %5 : vector<16x128xf32>
    %cst_11 = arith.constant dense<0.000000e+00> : vector<16xf32>
    %13 = vector.multi_reduction <add>, %12, %cst_11 [1] : vector<16x128xf32> to vector<16xf32>
    %14 = vector.shape_cast %13 : vector<16xf32> to vector<16x1xf32>
    %cst_12 = arith.constant 3.125000e-02 : f32
    %15 = vector.broadcast %cst_12 : f32 to vector<16x1xf32>
    %16 = arith.mulf %14, %15 : vector<16x1xf32>
    %17 = arith.mulf %11, %11 : vector<16x1xf32>
    %18 = arith.subf %16, %17 : vector<16x1xf32>
    %cst_13 = arith.constant 0.000000e+00 : f32
    %19 = vector.broadcast %cst_13 : f32 to vector<16x1xf32>
    %20 = arith.maximumf %18, %19 : vector<16x1xf32>
    %21 = vector.broadcast %11 : vector<16x1xf32> to vector<16x128xf32>
    %22 = arith.subf %5, %21 : vector<16x128xf32>
    %cst_14 = arith.constant 9.99999974E-6 : f32
    %23 = vector.broadcast %cst_14 : f32 to vector<16x1xf32>
    %24 = arith.addf %20, %23 : vector<16x1xf32>
    %25 = math.rsqrt %24 : vector<16x1xf32>
    %26 = vector.broadcast %25 : vector<16x1xf32> to vector<16x128xf32>
    %27 = arith.mulf %22, %26 : vector<16x128xf32>
    %28 = vector.broadcast %6 : vector<1x128xf32> to vector<16x128xf32>
    %29 = arith.mulf %27, %28 : vector<16x128xf32>
    %30 = vector.broadcast %7 : vector<1x128xf32> to vector<16x128xf32>
    %31 = arith.addf %29, %30 : vector<16x128xf32>
    %c0_15 = arith.constant 0 : index
    %c0_16 = arith.constant 0 : index
    %32 = vector.load %arg6[%c0_15, %c0_16] : memref<16x128xf32, #tpu.memory_space<vmem>>, vector<16x128xf32>
    tpu.vector_store %arg6[%c0_15, %c0_16], %31 {strides = array<i32>} : memref<16x128xf32, #tpu.memory_space<vmem>>, vector<16x128xf32>,
    return
  }
  func.func @transform_0(%arg0: i32) -> (i32, i32) {
    %c0_i32 = arith.constant 0 : i32
    %c0_i32_0 = arith.constant 0 : i32
    return %arg0, %c0_i32 : i32, i32
  }
  func.func @transform_1(%arg0: i32) -> (i32, i32) {
    %c0_i32 = arith.constant 0 : i32
    %c0_i32_0 = arith.constant 0 : i32
    %c0_i32_1 = arith.constant 0 : i32
    return %c0_i32, %c0_i32_0 : i32, i32
  }
  func.func @transform_2(%arg0: i32) -> (i32, i32) {
    %c0_i32 = arith.constant 0 : i32
    %c0_i32_0 = arith.constant 0 : i32
    %c0_i32_1 = arith.constant 0 : i32
    return %c0_i32, %c0_i32_0 : i32, i32
  }
  func.func @transform_3(%arg0: i32) -> (i32, i32) {
    %c0_i32 = arith.constant 0 : i32
    %c0_i32_0 = arith.constant 0 : i32
    %c0_i32_1 = arith.constant 0 : i32
    return %c0_i32, %c0_i32_0 : i32, i32
  }
  func.func @transform_4(%arg0: i32) -> (i32, i32) {
    %c0_i32 = arith.constant 0 : i32
    %c0_i32_0 = arith.constant 0 : i32
    %c0_i32_1 = arith.constant 0 : i32
    return %c0_i32, %c0_i32_0 : i32, i32
  }
  func.func @transform_5(%arg0: i32) -> (i32, i32) {
    %c0_i32 = arith.constant 0 : i32
    %c0_i32_0 = arith.constant 0 : i32
    return %arg0, %c0_i32 : i32, i32
  }
}

module attributes {stable_mosaic.version = 11 : i64} {
  func.func @_fused_kernel(%arg0: i32, %arg1: memref<16x32xf32, #tpu.memory_space<vmem>>, %arg2: memref<32x128xf32, #tpu.memory_space<vmem>>, %arg3: memref<1x128xf32, #tpu.memory_space<vmem>>, %arg4: memref<1x128xf32, #tpu.memory_space<vmem>>, %arg5: memref<1x128xf32, #tpu.memory_space<vmem>>, %arg6: memref<16x128xf32, #tpu.memory_space<vmem>>) attributes {dimension_semantics = [#tpu.dimension_semantics<parallel>], iteration_bounds = array<i64: 1>, scalar_prefetch = 0 : i64, scratch_operands = 0 : i64, tpu.core_type = #tpu.core_type<tc>, window_params = [{transform_indices = @transform_0, window_bounds = array<i64: 16, 32>}, {pipeline_mode = #tpu.pipeline_mode<synchronous>, transform_indices = @transform_1, window_bounds = array<i64: 32, 128>}, {pipeline_mode = #tpu.pipeline_mode<synchronous>, transform_indices = @transform_2, window_bounds = array<i64: 1, 128>}, {pipeline_mode = #tpu.pipeline_mode<synchronous>, transform_indices = @transform_3, window_bounds = array<i64: 1, 128>}, {pipeline_mode = #tpu.pipeline_mode<synchronous>, transform_indices = @transform_4, window_bounds = array<i64: 1, 128>}, {transform_indices = @transform_5, window_bounds = array<i64: 16, 128>}]} {
    %c0 = arith.constant 0 : index
    %c0_0 = arith.constant 0 : index
    %0 = vector.load %arg1[%c0, %c0_0] : memref<16x32xf32, #tpu.memory_space<vmem>>, vector<16x32xf32>
    %c0_1 = arith.constant 0 : index
    %c0_2 = arith.constant 0 : index
    %1 = vector.load %arg2[%c0_1, %c0_2] : memref<32x128xf32, #tpu.memory_space<vmem>>, vector<32x128xf32>
    %cst = arith.constant dense<0.000000e+00> : vector<16x128xf32>
    %2 = tpu.matmul %0, %1, %cst {dimension_numbers = #tpu.dot_dimension_numbers<[1], [0], [0], [1], [0, 0, 1, 1], [], []>} : vector<16x32xf32>, vector<32x128xf32>, vector<16x128xf32> -> vector<16x128xf32>
    %c0_3 = arith.constant 0 : index
    %c0_4 = arith.constant 0 : index
    %3 = vector.load %arg3[%c0_3, %c0_4] : memref<1x128xf32, #tpu.memory_space<vmem>>, vector<1x128xf32>
    %4 = vector.broadcast %3 : vector<1x128xf32> to vector<16x128xf32>
    %5 = arith.addf %2, %4 : vector<16x128xf32>
    %c0_5 = arith.constant 0 : index
    %c0_6 = arith.constant 0 : index
    %6 = vector.load %arg4[%c0_5, %c0_6] : memref<1x128xf32, #tpu.memory_space<vmem>>, vector<1x128xf32>
    %c0_7 = arith.constant 0 : index
    %c0_8 = arith.constant 0 : index
    %7 = vector.load %arg5[%c0_7, %c0_8] : memref<1x128xf32, #tpu.memory_space<vmem>>, vector<1x128xf32>
    %cst_9 = arith.constant dense<0.000000e+00> : vector<16xf32>
    %8 = vector.multi_reduction <add>, %5, %cst_9 [1] : vector<16x128xf32> to vector<16xf32>
    %9 = vector.shape_cast %8 : vector<16xf32> to vector<16x1xf32>
    %cst_10 = arith.constant 3.125000e-02 : f32
    %10 = vector.broadcast %cst_10 : f32 to vector<16x1xf32>
    %11 = arith.mulf %9, %10 : vector<16x1xf32>
    %12 = arith.mulf %5, %5 : vector<16x128xf32>
    %cst_11 = arith.constant dense<0.000000e+00> : vector<16xf32>
    %13 = vector.multi_reduction <add>, %12, %cst_11 [1] : vector<16x128xf32> to vector<16xf32>
    %14 = vector.shape_cast %13 : vector<16xf32> to vector<16x1xf32>
    %cst_12 = arith.constant 3.125000e-02 : f32
    %15 = vector.broadcast %cst_12 : f32 to vector<16x1xf32>
    %16 = arith.mulf %14, %15 : vector<16x1xf32>
    %17 = arith.mulf %11, %11 : vector<16x1xf32>
    %18 = arith.subf %16, %17 : vector<16x1xf32>
    %cst_13 = arith.constant 0.000000e+00 : f32
    %19 = vector.broadcast %cst_13 : f32 to vector<16x1xf32>
    %20 = arith.maximumf %18, %19 : vector<16x1xf32>
    %21 = vector.broadcast %11 : vector<16x1xf32> to vector<16x128xf32>
    %22 = arith.subf %5, %21 : vector<16x128xf32>
    %cst_14 = arith.constant 9.99999974E-6 : f32
    %23 = vector.broadcast %cst_14 : f32 to vector<16x1xf32>
    %24 = arith.addf %20, %23 : vector<16x1xf32>
    %25 = math.rsqrt %24 : vector<16x1xf32>
    %26 = vector.broadcast %25 : vector<16x1xf32> to vector<16x128xf32>
    %27 = arith.mulf %22, %26 : vector<16x128xf32>
    %28 = vector.broadcast %6 : vector<1x128xf32> to vector<16x128xf32>
    %29 = arith.mulf %27, %28 : vector<16x128xf32>
    %30 = vector.broadcast %7 : vector<1x128xf32> to vector<16x128xf32>
    %31 = arith.addf %29, %30 : vector<16x128xf32>
    %c0_15 = arith.constant 0 : index
    %c0_16 = arith.constant 0 : index
    %32 = vector.load %arg6[%c0_15, %c0_16] : memref<16x128xf32, #tpu.memory_space<vmem>>, vector<16x128xf32>
    tpu.vector_store %arg6[%c0_15, %c0_16], %31 {strides = array<i32>} : memref<16x128xf32, #tpu.memory_space<vmem>>, vector<16x128xf32>,
    return
  }
  func.func @transform_0(%arg0: i32) -> (i32, i32) {
    %c0_i32 = arith.constant 0 : i32
    %c0_i32_0 = arith.constant 0 : i32
    return %arg0, %c0_i32 : i32, i32
  }
  func.func @transform_1(%arg0: i32) -> (i32, i32) {
    %c0_i32 = arith.constant 0 : i32
    %c0_i32_0 = arith.constant 0 : i32
    %c0_i32_1 = arith.constant 0 : i32
    return %c0_i32, %c0_i32_0 : i32, i32
  }
  func.func @transform_2(%arg0: i32) -> (i32, i32) {
    %c0_i32 = arith.constant 0 : i32
    %c0_i32_0 = arith.constant 0 : i32
    %c0_i32_1 = arith.constant 0 : i32
    return %c0_i32, %c0_i32_0 : i32, i32
  }
  func.func @transform_3(%arg0: i32) -> (i32, i32) {
    %c0_i32 = arith.constant 0 : i32
    %c0_i32_0 = arith.constant 0 : i32
    %c0_i32_1 = arith.constant 0 : i32
    return %c0_i32, %c0_i32_0 : i32, i32
  }
  func.func @transform_4(%arg0: i32) -> (i32, i32) {
    %c0_i32 = arith.constant 0 : i32
    %c0_i32_0 = arith.constant 0 : i32
    %c0_i32_1 = arith.constant 0 : i32
    return %c0_i32, %c0_i32_0 : i32, i32
  }
  func.func @transform_5(%arg0: i32) -> (i32, i32) {
    %c0_i32 = arith.constant 0 : i32
    %c0_i32_0 = arith.constant 0 : i32
    return %arg0, %c0_i32 : i32, i32
  }
}

</mosaic_0001>

<bundles_post_ra>
// kernel: tpu_custom_call.1
= control target key start
LH: loop header
LB: loop body
LE: loop exit
PB: predicated region body
PF: predicated region fallthrough
CT: control target
= control target key end

     0   :  { %10 = vsyncpa [#allocation3], 0  ;;  %s331_s0 = inlined_call_operand.hbm [shape: f32[16,32], index: 0, kind: input, shape index: {}]   ;;  %s332_s1 = inlined_call_operand.hbm [shape: f32[32,128], index: 1, kind: input, shape index: {}]   ;;  %s333_s2 = inlined_call_operand.vmem [shape: f32[1,128], index: 2, kind: input, shape index: {}]   ;;  %s334_s3 = inlined_call_operand.vmem [shape: f32[1,128], index: 3, kind: input, shape index: {}]   ;;  %s335_s4 = inlined_call_operand.vmem [shape: f32[1,128], index: 4, kind: input, shape index: {}]   ;;  %s336_s5 = inlined_call_operand.hbm [shape: f32[16,128], index: 5, kind: output, shape index: {}]  }
   0x1   :  { %11 = vsyncpa [#allocation6], 0 }
   0x2   :  { %12 = vsyncpa [#allocation4], 0  ;;  %s17_s20 = sshll.u32 %s331_s0, 4  ;;  %s269_s21 = smov [#allocation2]   ;;  %s18_s20 = int_to_ptr.hbm [resolvable:$true] %s17_s20 }
   0x3   :  { %s19_s22 = sshll.u32 %s269_s21, 4  ;;  %s30_s25 = sshll.u32 %s332_s1, 4  ;;  %s20_s22 = int_to_ptr.vmem [resolvable:$true] %s19_s22  ;;  %s31_s25 = int_to_ptr.hbm [resolvable:$true] %s30_s25 }
   0x4   :  { %s270_s26 = smov 128   ;;  %s271_s27 = smov 8  }
   0x5   :  { %25 = dma.hbm_to_vmem [thread:$0]  %s18_s20, 256, %s20_s22, [#allocation3], %s270_s26, %s270_s26, %s271_s27  }
   0x6   :  { %s272_s28 = smov [#allocation5]  }
   0x7   :  { %s32_s29 = sshll.u32 %s272_s28, 4  ;;  %s33_s29 = int_to_ptr.vmem [resolvable:$true] %s32_s29 }
   0x8   :  { %38 = dma.hbm_to_vmem [thread:$0]  %s31_s25, 512, %s33_s29, [#allocation6], %s270_s26, %s270_s26, %s271_s27  }
   0x9   :  { %263 = dma.done.wait [#allocation3], 256  }
   0xa   :  { %264 = vsyncadd [#allocation3], 4294967040 }
   0xb   :  { %265 = dma.done.wait [#allocation6], 512  }
   0xc   :  { %266 = vsyncadd [#allocation6], 4294966784  ;;  %v58_v0 = vld [vmem:[#allocation5 + $0x18] sm:$0xff]  ;;  %v57_v1 = vld [vmem:[#allocation5 + $0x10] sm:$0xff]  ;;  %vm63_vm0 = vcmask 261120   ;;  %s159_s11 = sshll.u32 %s336_s5, 4  ;;  %s160_s11 = int_to_ptr.hbm [resolvable:$true] %s159_s11 }
   0xd   :  { %82 = vmatpush.msra.mxu0 %v58_v0  ;;  %175 = vmatpush.msra.mxu1 %v58_v0  ;;  %v56_v2 = vld [vmem:[#allocation5 + $0x8] sm:$0xff]  ;;  %v55_v3 = vld [vmem:[#allocation5] sm:$0xff]  ;;  %v53_v4 = vld [vmem:[#allocation2] sm:$0xff] }
   0xe   :  { %v54_v5 = vld [vmem:[#allocation2 + $0x8] sm:$0xff]  ;;  %v184_v6 = vld [vmem:[%s333_s2] ss:$0 sm:$0xff] }
   0xf   :  { %83 = vmatpush.msra.mxu0 %v57_v1  ;;  %176 = vmatpush.msra.mxu1 %v57_v1  ;;  %v185_v38 = vld [vmem:[%s334_s3] ss:$0 sm:$0xff]  ;;  %s273_s3 = smov [#allocation7]  }
  0x10   :  { %v186_v42 = vld [vmem:[%s335_s4] ss:$0 sm:$0xff]  ;;  %s157_s8 = sshll.u32 %s273_s3, 4  ;;  %s158_s8 = int_to_ptr.vmem [resolvable:$true] %s157_s8 }
  0x11   :  { %84 = vmatpush.msra.mxu0 %v56_v2  ;;  %177 = vmatpush.msra.mxu1 %v56_v2 }
  0x13   :  { %85 = vmatpush.msra.mxu0 %v55_v3  ;;  %178 = vmatpush.msra.mxu1 %v55_v3 }
  0x14   :  { %173 = vmatmul.msk.f32.vlgmr.msra.gmra.mxu0 %vm63_vm0, %v53_v4  ;;  %174 = vmatmul.msk.f32.vlgmr.msra.gmra.mxu1 %vm63_vm0, %v54_v5 }
  0x91   :  { %v87_v7 = vpop.f32.mrf.mxu0  ;;  %v90_v9 = vpop.f32.mrf.mxu1 }
  0x92   :  { %v88_v8 = vadd.f32 %v184_v6, %v87_v7  ;;  %v91_v11 = vadd.f32 %v184_v6, %v90_v9 }
  0x94   :  { %95 = vadd.xlane.f32.xlu0 %v88_v8  ;;  %v101_v10 = vmul.f32 %v88_v8, %v88_v8  ;;  %v102_v12 = vmul.f32 %v91_v11, %v91_v11 }
  0x96   :  { %103 = vadd.xlane.f32.xlu1 %v101_v10 }
  0x9c   :  { %97 = vadd.xlane.f32.xlu0 %v91_v11 }
  0x9e   :  { %105 = vadd.xlane.f32.xlu1 %v102_v12 }
 0x107   :  { %v96_v13 = vpop.xlane.xlu0 %95 }
 0x108   :  { %v99_v14 = vmul.f32 0.03125, %v96_v13 }
 0x109   :  { %v104_v15 = vpop.xlane.xlu1 %103 }
 0x10a   :  { %v109_v16 = vmul.f32 %v99_v14, %v99_v14  ;;  %v107_v17 = vmul.f32 0.03125, %v104_v15  ;;  %v115_v36 = vsub.f32 %v88_v8, %v99_v14 }
 0x10c   :  { %v111_v18 = vsub.f32 %v107_v17, %v109_v16 }
 0x10e   :  { %v113_v19 = vmax.f32 %v111_v18, 0.0 }
 0x10f   :  { %v98_v20 = vpop.xlane.xlu0 %97 }
 0x110   :  { %v117_v21 = vadd.f32 1e-05, %v113_v19  ;;  %v100_v22 = vmul.f32 0.03125, %v98_v20 }
 0x111   :  { %v106_v23 = vpop.xlane.xlu1 %105 }
 0x112   :  { %187 = vrsqrt.f32 %v117_v21  ;;  %v110_v24 = vmul.f32 %v100_v22, %v100_v22  ;;  %v108_v25 = vmul.f32 0.03125, %v106_v23  ;;  %vm125_vm2 = vweird.f32 %v117_v21 }
 0x113   :  { %v116_v48 = vsub.f32 %v91_v11, %v100_v22 }
 0x114   :  { %v112_v26 = vsub.f32 %v108_v25, %v110_v24 }
 0x116   :  { %v114_v27 = vmax.f32 %v112_v26, 0.0 }
 0x118   :  { %v188_v28 = vpop.eup %187  ;;  %v118_v30 = vadd.f32 1e-05, %v114_v27 }
 0x119   :  { %v120_v29 = vmul.f32 %v188_v28, %v117_v21  ;;  %vm126_vm1 = vweird.f32 %v188_v28 }
 0x11a   :  { %189 = vrsqrt.f32 %v118_v30  ;;  %vm127_vm3 = vmor %vm125_vm2, %vm126_vm1  ;;  %vm135_vm5 = vweird.f32 %v118_v30 }
 0x11b   :  { %v121_v31 = vmul.f32 %v188_v28, %v120_v29 }
 0x11d   :  { %v122_v32 = vmul.f32 0.5, %v121_v31 }
 0x11f   :  { %v123_v33 = vsub.f32 1.5, %v122_v32 }
 0x120   :  { %v190_v34 = vpop.eup %189 }
 0x121   :  { %v124_v35 = vmul.f32 %v188_v28, %v123_v33  ;;  %v130_v37 = vmul.f32 %v190_v34, %v118_v30  ;;  %vm136_vm4 = vweird.f32 %v190_v34 }
 0x122   :  { %vm137_vm6 = vmor %vm135_vm5, %vm136_vm4 }
 0x123   :  { %v128_v39 = vsel %vm127_vm3, %v188_v28, %v124_v35  ;;  %v131_v40 = vmul.f32 %v190_v34, %v130_v37 }
 0x124   :  { %v139_v41 = vmul.f32 %v128_v39, %v115_v36 }
 0x125   :  { %v132_v43 = vmul.f32 0.5, %v131_v40 }
 0x126   :  { %v144_v44 = vmul.f32 %v185_v38, %v139_v41 }
 0x127   :  { %v133_v45 = vsub.f32 1.5, %v132_v43 }
 0x128   :  { %v149_v46 = vadd.f32 %v186_v42, %v144_v44 }
 0x129   :  { %v134_v47 = vmul.f32 %v190_v34, %v133_v45 }
 0x12a   :  { %151 = vst [vmem:[#allocation7] sm:$0xff] %v149_v46 }
 0x12b   :  { %v138_v49 = vsel %vm137_vm6, %v190_v34, %v134_v47 }
 0x12c   :  { %v140_v50 = vmul.f32 %v138_v49, %v116_v48 }
 0x12e   :  { %v145_v51 = vmul.f32 %v185_v38, %v140_v50 }
 0x130   :  { %v150_v52 = vadd.f32 %v186_v42, %v145_v51 }
 0x132   :  { %152 = vst [vmem:[#allocation7 + $0x8] sm:$0xff] %v150_v52 }
 0x133   :  { %165 = dma.vmem_to_hbm [thread:$0]  %s158_s8, 256, %s160_s11, [#allocation4], %s270_s26, %s270_s26, %s271_s27  }
 0x134   :  { %267 = dma.done.wait [#allocation4], 256  }
 0x135   :  { %268 = vsyncadd [#allocation4], 4294967040 }
 0x136   :  { %170 = vsyncpa [#allocation3], 1 }
 0x137   :  { %171 = vsyncpa [#allocation6], 1 }
 0x138   :  { %172 = vsyncpa [#allocation4], 1 }

// kernel: tpu_custom_call.1
= control target key start
LH: loop header
LB: loop body
LE: loop exit
PB: predicated region body
PF: predicated region fallthrough
CT: control target
= control target key end

     0   :  { %10 = vsyncpa [#allocation3], 0  ;;  %s331_s0 = inlined_call_operand.hbm [shape: f32[16,32], index: 0, kind: input, shape index: {}]   ;;  %s332_s1 = inlined_call_operand.hbm [shape: f32[32,128], index: 1, kind: input, shape index: {}]   ;;  %s333_s2 = inlined_call_operand.vmem [shape: f32[1,128], index: 2, kind: input, shape index: {}]   ;;  %s334_s3 = inlined_call_operand.vmem [shape: f32[1,128], index: 3, kind: input, shape index: {}]   ;;  %s335_s4 = inlined_call_operand.vmem [shape: f32[1,128], index: 4, kind: input, shape index: {}]   ;;  %s336_s5 = inlined_call_operand.hbm [shape: f32[16,128], index: 5, kind: output, shape index: {}]  }
   0x1   :  { %11 = vsyncpa [#allocation6], 0 }
   0x2   :  { %12 = vsyncpa [#allocation4], 0  ;;  %s17_s20 = sshll.u32 %s331_s0, 4  ;;  %s269_s21 = smov [#allocation2]   ;;  %s18_s20 = int_to_ptr.hbm [resolvable:$true] %s17_s20 }
   0x3   :  { %s19_s22 = sshll.u32 %s269_s21, 4  ;;  %s30_s25 = sshll.u32 %s332_s1, 4  ;;  %s20_s22 = int_to_ptr.vmem [resolvable:$true] %s19_s22  ;;  %s31_s25 = int_to_ptr.hbm [resolvable:$true] %s30_s25 }
   0x4   :  { %s270_s26 = smov 128   ;;  %s271_s27 = smov 8  }
   0x5   :  { %25 = dma.hbm_to_vmem [thread:$0]  %s18_s20, 256, %s20_s22, [#allocation3], %s270_s26, %s270_s26, %s271_s27  }
   0x6   :  { %s272_s28 = smov [#allocation5]  }
   0x7   :  { %s32_s29 = sshll.u32 %s272_s28, 4  ;;  %s33_s29 = int_to_ptr.vmem [resolvable:$true] %s32_s29 }
   0x8   :  { %38 = dma.hbm_to_vmem [thread:$0]  %s31_s25, 512, %s33_s29, [#allocation6], %s270_s26, %s270_s26, %s271_s27  }
   0x9   :  { %263 = dma.done.wait [#allocation3], 256  }
   0xa   :  { %264 = vsyncadd [#allocation3], 4294967040 }
   0xb   :  { %265 = dma.done.wait [#allocation6], 512  }
   0xc   :  { %266 = vsyncadd [#allocation6], 4294966784  ;;  %v58_v0 = vld [vmem:[#allocation5 + $0x18] sm:$0xff]  ;;  %v57_v1 = vld [vmem:[#allocation5 + $0x10] sm:$0xff]  ;;  %vm63_vm0 = vcmask 261120   ;;  %s159_s11 = sshll.u32 %s336_s5, 4  ;;  %s160_s11 = int_to_ptr.hbm [resolvable:$true] %s159_s11 }
   0xd   :  { %82 = vmatpush.msra.mxu0 %v58_v0  ;;  %175 = vmatpush.msra.mxu1 %v58_v0  ;;  %v56_v2 = vld [vmem:[#allocation5 + $0x8] sm:$0xff]  ;;  %v55_v3 = vld [vmem:[#allocation5] sm:$0xff]  ;;  %v53_v4 = vld [vmem:[#allocation2] sm:$0xff] }
   0xe   :  { %v54_v5 = vld [vmem:[#allocation2 + $0x8] sm:$0xff]  ;;  %v184_v6 = vld [vmem:[%s333_s2] ss:$0 sm:$0xff] }
   0xf   :  { %83 = vmatpush.msra.mxu0 %v57_v1  ;;  %176 = vmatpush.msra.mxu1 %v57_v1  ;;  %v185_v38 = vld [vmem:[%s334_s3] ss:$0 sm:$0xff]  ;;  %s273_s3 = smov [#allocation7]  }
  0x10   :  { %v186_v42 = vld [vmem:[%s335_s4] ss:$0 sm:$0xff]  ;;  %s157_s8 = sshll.u32 %s273_s3, 4  ;;  %s158_s8 = int_to_ptr.vmem [resolvable:$true] %s157_s8 }
  0x11   :  { %84 = vmatpush.msra.mxu0 %v56_v2  ;;  %177 = vmatpush.msra.mxu1 %v56_v2 }
  0x13   :  { %85 = vmatpush.msra.mxu0 %v55_v3  ;;  %178 = vmatpush.msra.mxu1 %v55_v3 }
  0x14   :  { %173 = vmatmul.msk.f32.vlgmr.msra.gmra.mxu0 %vm63_vm0, %v53_v4  ;;  %174 = vmatmul.msk.f32.vlgmr.msra.gmra.mxu1 %vm63_vm0, %v54_v5 }
  0x91   :  { %v87_v7 = vpop.f32.mrf.mxu0  ;;  %v90_v9 = vpop.f32.mrf.mxu1 }
  0x92   :  { %v88_v8 = vadd.f32 %v184_v6, %v87_v7  ;;  %v91_v11 = vadd.f32 %v184_v6, %v90_v9 }
  0x94   :  { %95 = vadd.xlane.f32.xlu0 %v88_v8  ;;  %v101_v10 = vmul.f32 %v88_v8, %v88_v8  ;;  %v102_v12 = vmul.f32 %v91_v11, %v91_v11 }
  0x96   :  { %103 = vadd.xlane.f32.xlu1 %v101_v10 }
  0x9c   :  { %97 = vadd.xlane.f32.xlu0 %v91_v11 }
  0x9e   :  { %105 = vadd.xlane.f32.xlu1 %v102_v12 }
 0x107   :  { %v96_v13 = vpop.xlane.xlu0 %95 }
 0x108   :  { %v99_v14 = vmul.f32 0.03125, %v96_v13 }
 0x109   :  { %v104_v15 = vpop.xlane.xlu1 %103 }
 0x10a   :  { %v109_v16 = vmul.f32 %v99_v14, %v99_v14  ;;  %v107_v17 = vmul.f32 0.03125, %v104_v15  ;;  %v115_v36 = vsub.f32 %v88_v8, %v99_v14 }
 0x10c   :  { %v111_v18 = vsub.f32 %v107_v17, %v109_v16 }
 0x10e   :  { %v113_v19 = vmax.f32 %v111_v18, 0.0 }
 0x10f   :  { %v98_v20 = vpop.xlane.xlu0 %97 }
 0x110   :  { %v117_v21 = vadd.f32 1e-05, %v113_v19  ;;  %v100_v22 = vmul.f32 0.03125, %v98_v20 }
 0x111   :  { %v106_v23 = vpop.xlane.xlu1 %105 }
 0x112   :  { %187 = vrsqrt.f32 %v117_v21  ;;  %v110_v24 = vmul.f32 %v100_v22, %v100_v22  ;;  %v108_v25 = vmul.f32 0.03125, %v106_v23  ;;  %vm125_vm2 = vweird.f32 %v117_v21 }
 0x113   :  { %v116_v48 = vsub.f32 %v91_v11, %v100_v22 }
 0x114   :  { %v112_v26 = vsub.f32 %v108_v25, %v110_v24 }
 0x116   :  { %v114_v27 = vmax.f32 %v112_v26, 0.0 }
 0x118   :  { %v188_v28 = vpop.eup %187  ;;  %v118_v30 = vadd.f32 1e-05, %v114_v27 }
 0x119   :  { %v120_v29 = vmul.f32 %v188_v28, %v117_v21  ;;  %vm126_vm1 = vweird.f32 %v188_v28 }
 0x11a   :  { %189 = vrsqrt.f32 %v118_v30  ;;  %vm127_vm3 = vmor %vm125_vm2, %vm126_vm1  ;;  %vm135_vm5 = vweird.f32 %v118_v30 }
 0x11b   :  { %v121_v31 = vmul.f32 %v188_v28, %v120_v29 }
 0x11d   :  { %v122_v32 = vmul.f32 0.5, %v121_v31 }
 0x11f   :  { %v123_v33 = vsub.f32 1.5, %v122_v32 }
 0x120   :  { %v190_v34 = vpop.eup %189 }
 0x121   :  { %v124_v35 = vmul.f32 %v188_v28, %v123_v33  ;;  %v130_v37 = vmul.f32 %v190_v34, %v118_v30  ;;  %vm136_vm4 = vweird.f32 %v190_v34 }
 0x122   :  { %vm137_vm6 = vmor %vm135_vm5, %vm136_vm4 }
 0x123   :  { %v128_v39 = vsel %vm127_vm3, %v188_v28, %v124_v35  ;;  %v131_v40 = vmul.f32 %v190_v34, %v130_v37 }
 0x124   :  { %v139_v41 = vmul.f32 %v128_v39, %v115_v36 }
 0x125   :  { %v132_v43 = vmul.f32 0.5, %v131_v40 }
 0x126   :  { %v144_v44 = vmul.f32 %v185_v38, %v139_v41 }
 0x127   :  { %v133_v45 = vsub.f32 1.5, %v132_v43 }
 0x128   :  { %v149_v46 = vadd.f32 %v186_v42, %v144_v44 }
 0x129   :  { %v134_v47 = vmul.f32 %v190_v34, %v133_v45 }
 0x12a   :  { %151 = vst [vmem:[#allocation7] sm:$0xff] %v149_v46 }
 0x12b   :  { %v138_v49 = vsel %vm137_vm6, %v190_v34, %v134_v47 }
 0x12c   :  { %v140_v50 = vmul.f32 %v138_v49, %v116_v48 }
 0x12e   :  { %v145_v51 = vmul.f32 %v185_v38, %v140_v50 }
 0x130   :  { %v150_v52 = vadd.f32 %v186_v42, %v145_v51 }
 0x132   :  { %152 = vst [vmem:[#allocation7 + $0x8] sm:$0xff] %v150_v52 }
 0x133   :  { %165 = dma.vmem_to_hbm [thread:$0]  %s158_s8, 256, %s160_s11, [#allocation4], %s270_s26, %s270_s26, %s271_s27  }
 0x134   :  { %267 = dma.done.wait [#allocation4], 256  }
 0x135   :  { %268 = vsyncadd [#allocation4], 4294967040 }
 0x136   :  { %170 = vsyncpa [#allocation3], 1 }
 0x137   :  { %171 = vsyncpa [#allocation6], 1 }
 0x138   :  { %172 = vsyncpa [#allocation4], 1 }

</bundles_post_ra>
